<compile_context>
chip_gen: v7x
topology: tpu7x:2x2x1
jax: 0.10.0
libtpu: 0.0.40
codegen_flags: <defaults>
</compile_context>

<pallas_src>
import functools

import jax
import jax.numpy as jnp
from jax.experimental import pallas as pl
from jax.experimental.pallas import tpu as pltpu

EPS = 1e-5


def _ln(x, g, b, eps):
    mu = jnp.mean(x, axis=-1, keepdims=True)
    var = jnp.mean((x - mu) ** 2, axis=-1, keepdims=True)
    return (x - mu) * jax.lax.rsqrt(var + eps) * g + b


# --------------------------- embedding LayerNorm ---------------------------

def _layernorm_kernel(x_ref, g_ref, b_ref, o_ref, *, eps):
    o_ref[...] = _ln(x_ref[...], g_ref[...], b_ref[...], eps)


def layernorm(x, g, b, eps=EPS):
    M, N = x.shape
    return pl.pallas_call(
        functools.partial(_layernorm_kernel, eps=eps),
        out_shape=jax.ShapeDtypeStruct((M, N), jnp.float32),
    )(x, g.reshape(1, N), b.reshape(1, N))


# ------------------- fused encoder layer, grid=(B,) ------------------------

def _encoder_layer_kernel(x_ref,
                          w_qkv_ref, b_qkv_ref,
                          wo_ref, bo_ref, ln1_g_ref, ln1_b_ref,
                          w_ff1_ref, b_ff1_ref, w_ff2_ref, b_ff2_ref,
                          ln2_g_ref, ln2_b_ref,
                          o_ref, *, H, Dp, eps):
    x = x_ref[0]                                        # (S, D) f32 residual stream
    xb = x.astype(jnp.bfloat16)

    # fused QKV projection (softmax scale already folded into Q columns at init)
    qkv = jnp.dot(xb, w_qkv_ref[...], preferred_element_type=jnp.float32)
    qkv = (qkv + b_qkv_ref[...]).astype(jnp.bfloat16)   # (S, 3*H*Dp)
    Dq = H * Dp

    # per-head attention; Dp=128 so every slice / the concat is lane-tile aligned
    outs = []
    for h in range(H):                                  # static unrolled head loop
        q = qkv[:, h * Dp:(h + 1) * Dp]                 # (S, Dp) bf16
        k = qkv[:, Dq + h * Dp:Dq + (h + 1) * Dp]
        v = qkv[:, 2 * Dq + h * Dp:2 * Dq + (h + 1) * Dp]
        s = jax.lax.dot_general(q, k, (((1,), (1,)), ((), ())),
                                preferred_element_type=jnp.float32)   # (S, S)
        s = s - jnp.max(s, axis=-1, keepdims=True)
        p = jnp.exp(s)
        p = p * pl.reciprocal(jnp.sum(p, axis=-1, keepdims=True), approx=True)
        outs.append(jnp.dot(p.astype(jnp.bfloat16), v,
                            preferred_element_type=jnp.float32))
    ctx = jnp.concatenate(outs, axis=-1).astype(jnp.bfloat16)         # (S, Dq)

    # attention output projection + bias + residual + LayerNorm (f32)
    attn = jnp.dot(ctx, wo_ref[...], preferred_element_type=jnp.float32)
    x1 = _ln(attn + bo_ref[...] + x, ln1_g_ref[...], ln1_b_ref[...], eps)

    # FFN + bias + residual + LayerNorm (f32 accumulate / stats)
    h1 = jnp.dot(x1.astype(jnp.bfloat16), w_ff1_ref[...],
                 preferred_element_type=jnp.float32)
    h1 = jax.nn.gelu(h1 + b_ff1_ref[...], approximate=True)
    y = jnp.dot(h1.astype(jnp.bfloat16), w_ff2_ref[...],
                preferred_element_type=jnp.float32)
    y = y + b_ff2_ref[...] + x1
    o_ref[0] = _ln(y, ln2_g_ref[...], ln2_b_ref[...], eps)


def encoder_layer(x, lyr, *, n_heads, head_pad):
    B, S, D = x.shape
    Dq = n_heads * head_pad
    F = lyr["w_ff1"].shape[1]
    row = lambda a: a.reshape(1, -1)

    def const(shape):
        return pl.BlockSpec(shape, lambda b: (0,) * len(shape))

    return pl.pallas_call(
        functools.partial(_encoder_layer_kernel, H=n_heads, Dp=head_pad, eps=EPS),
        grid=(B,),
        in_specs=[
            pl.BlockSpec((1, S, D), lambda b: (b, 0, 0)),      # x (per batch elem)
            const((D, 3 * Dq)), const((1, 3 * Dq)),            # w_qkv, b_qkv
            const((Dq, D)), const((1, D)),                     # wo, bo
            const((1, D)), const((1, D)),                      # ln1 gamma/beta
            const((D, F)), const((1, F)),                      # w_ff1, b_ff1
            const((F, D)), const((1, D)),                      # w_ff2, b_ff2
            const((1, D)), const((1, D)),                      # ln2 gamma/beta
        ],
        out_specs=pl.BlockSpec((1, S, D), lambda b: (b, 0, 0)),
        out_shape=jax.ShapeDtypeStruct((B, S, D), jnp.float32),
        compiler_params=pltpu.CompilerParams(
            dimension_semantics=("parallel",),
            vmem_limit_bytes=56 * 1024 * 1024),
    )(x,
      lyr["w_qkv"], row(lyr["b_qkv"]),
      lyr["wo"], row(lyr["bo"]), row(lyr["ln1_g"]), row(lyr["ln1_b"]),
      lyr["w_ff1"], row(lyr["b_ff1"]), lyr["w_ff2"], row(lyr["b_ff2"]),
      row(lyr["ln2_g"]), row(lyr["ln2_b"]))


# ------------------------------- fused head --------------------------------

def _head_kernel(num_ref, cls_ref,
                 gn_ref, bn_ref,              # numeric_norm (13)
                 gb_ref, bb_ref,              # bert_norm (768)
                 w1_ref, b1_ref, g1_ref, h1b_ref,            # hidden1: 768->3 + LN(3)
                 w2n_ref, w2e_ref, b2_ref, g2_ref, h2b_ref,  # hidden2: 16->50 + LN(50)
                 ws_ref, bs_ref,              # score: 50->1
                 o_ref, *, eps):
    numeric = _ln(num_ref[...], gn_ref[...], bn_ref[...], eps)            # (B, 13)
    cls = _ln(cls_ref[...], gb_ref[...], bb_ref[...], eps)                # (B, 768)

    e3 = jnp.dot(cls, w1_ref[...], preferred_element_type=jnp.float32) + b1_ref[...]
    e3 = jax.nn.relu(_ln(e3, g1_ref[...], h1b_ref[...], eps))             # (B, 3)

    # concat(numeric, e3) @ W2  ==  numeric @ W2[:13] + e3 @ W2[13:]
    h = (jnp.dot(numeric, w2n_ref[...], preferred_element_type=jnp.float32)
         + jnp.dot(e3, w2e_ref[...], preferred_element_type=jnp.float32)
         + b2_ref[...])
    h = jax.nn.relu(_ln(h, g2_ref[...], h2b_ref[...], eps))               # (B, 50)

    o_ref[...] = jnp.dot(h, ws_ref[...], preferred_element_type=jnp.float32) + bs_ref[...]


def head(numeric, cls, p):
    B = numeric.shape[0]
    r = lambda a: a.reshape(1, -1)
    return pl.pallas_call(
        functools.partial(_head_kernel, eps=EPS),
        out_shape=jax.ShapeDtypeStruct((B, 1), jnp.float32),
    )(numeric, cls,
      r(p["num_ln_g"]), r(p["num_ln_b"]),
      r(p["bert_ln_g"]), r(p["bert_ln_b"]),
      p["w1"], r(p["b1"]), r(p["h1_ln_g"]), r(p["h1_ln_b"]),
      p["w2"][:13], p["w2"][13:], r(p["b2"]), r(p["h2_ln_g"]), r(p["h2_ln_b"]),
      p["ws"], r(p["bs"]))


# ----------------------------- parameter init ------------------------------

def init_params(key, vocab_size=1000, hidden=768, n_layers=2, n_heads=12,
                head_dim=64, head_pad=128, intermediate=3072, max_pos=64,
                numeric_feats=13, hidden_dim=50):
    keys = iter(jax.random.split(key, 128))
    dense = lambda shape: (0.02 * jax.random.normal(next(keys), shape)).astype(jnp.float32)
    bf16 = lambda a: a.astype(jnp.bfloat16)
    ones = lambda n: jnp.ones((n,), jnp.float32)
    zeros = lambda n: jnp.zeros((n,), jnp.float32)

    def pad_cols(w):   # (D, H*head_dim) -> (D, H*head_pad), zero-pad each head
        d0 = w.shape[0]
        w3 = w.reshape(d0, n_heads, head_dim)
        pad = jnp.zeros((d0, n_heads, head_pad - head_dim), w.dtype)
        return jnp.concatenate([w3, pad], axis=-1).reshape(d0, n_heads * head_pad)

    def pad_rows(w):   # (H*head_dim, D) -> (H*head_pad, D), zero-pad each head
        d1 = w.shape[1]
        w3 = w.reshape(n_heads, head_dim, d1)
        pad = jnp.zeros((n_heads, head_pad - head_dim, d1), w.dtype)
        return jnp.concatenate([w3, pad], axis=1).reshape(n_heads * head_pad, d1)

    scale = 1.0 / (head_dim ** 0.5)   # softmax scale, folded into Q weights (q bias is 0)

    layers = []
    for _ in range(n_layers):
        wq = dense((hidden, hidden)) * scale
        wk = dense((hidden, hidden))
        wv = dense((hidden, hidden))
        layers.append(dict(
            # fused, head-padded QKV projection: (768, 3*12*128) bf16
            w_qkv=bf16(jnp.concatenate([pad_cols(wq), pad_cols(wk), pad_cols(wv)], axis=1)),
            b_qkv=zeros(3 * n_heads * head_pad),
            wo=bf16(pad_rows(dense((hidden, hidden)))), bo=zeros(hidden),
            ln1_g=ones(hidden), ln1_b=zeros(hidden),
            w_ff1=bf16(dense((hidden, intermediate))), b_ff1=zeros(intermediate),
            w_ff2=bf16(dense((intermediate, hidden))), b_ff2=zeros(hidden),
            ln2_g=ones(hidden), ln2_b=zeros(hidden),
        ))

    return dict(
        vocab_size=vocab_size, hidden=hidden, n_heads=n_heads, head_pad=head_pad,
        word_emb=dense((vocab_size, hidden)),
        pos_emb=dense((max_pos, hidden)),
        emb_ln_g=ones(hidden), emb_ln_b=zeros(hidden),
        layers=layers,
        # head parameters (as in CodeBertForSequence.__init__)
        num_ln_g=ones(numeric_feats), num_ln_b=zeros(numeric_feats),
        bert_ln_g=ones(hidden), bert_ln_b=zeros(hidden),
        w1=dense((hidden, 3)), b1=zeros(3),
        h1_ln_g=ones(3), h1_ln_b=zeros(3),
        w2=dense((numeric_feats + 3, hidden_dim)), b2=zeros(hidden_dim),
        h2_ln_g=ones(hidden_dim), h2_ln_b=zeros(hidden_dim),
        ws=dense((hidden_dim, 1)), bs=zeros(1),
    )


# ------------------------------ forward pass --------------------------------

def codebert_for_sequence(params, input_ids):
    numeric = input_ids[:, :13].astype(jnp.float32)              # (B, 13)
    tokens = input_ids[:, 13:].astype(jnp.int32)                 # (B, S)
    B, S = tokens.shape
    D = params["hidden"]

    # embeddings (gather is glue in plain JAX)
    x = params["word_emb"][tokens] + params["pos_emb"][:S][None, :, :]
    x = layernorm(x.reshape(B * S, D), params["emb_ln_g"], params["emb_ln_b"])
    x = x.reshape(B, S, D)

    # one fused pallas_call per encoder layer (weights VMEM-resident, grid=(B,))
    for lyr in params["layers"]:
        x = encoder_layer(x, lyr, n_heads=params["n_heads"],
                          head_pad=params["head_pad"])

    cls = x[:, 0, :]                                             # (B, 768) CLS embedding

    # fused head: numeric_norm + bert_norm + hidden1 + concat + hidden2 + score
    return head(numeric, cls, params)                            # (B, 1)


# ----------------------------------- main -----------------------------------

if __name__ == "__main__":
    key = jax.random.PRNGKey(0)
    pkey, nkey, tkey = jax.random.split(key, 3)

    B, S, NUMF = 2, 20, 13
    params = init_params(pkey)

    numeric = jax.random.normal(nkey, (B, NUMF), dtype=jnp.float32)
    tokens = jax.random.randint(tkey, (B, S), 0, params["vocab_size"]).astype(jnp.float32)
    input_ids = jnp.concatenate([numeric, tokens], axis=1)       # (B, 33)

    logit = codebert_for_sequence(params, input_ids)
    logit = jax.block_until_ready(logit)
    assert logit.shape == (B, 1) and logit.dtype == jnp.float32
    print("KERNEL_OK")
</pallas_src>

<mosaic_0001>
module attributes {stable_mosaic.version = 11 : i64} {
  func.func @_layernorm_kernel(%arg0: memref<40x768xf32, #tpu.memory_space<vmem>>, %arg1: memref<1x768xf32, #tpu.memory_space<vmem>>, %arg2: memref<1x768xf32, #tpu.memory_space<vmem>>, %arg3: memref<40x768xf32, #tpu.memory_space<vmem>>) attributes {dimension_semantics = [], scalar_prefetch = 0 : i64, scratch_operands = 0 : i64, tpu.core_type = #tpu.core_type<tc>} {
    %c0 = arith.constant 0 : index
    %c0_0 = arith.constant 0 : index
    %0 = vector.load %arg0[%c0, %c0_0] : memref<40x768xf32, #tpu.memory_space<vmem>>, vector<40x768xf32>
    %c0_1 = arith.constant 0 : index
    %c0_2 = arith.constant 0 : index
    %1 = vector.load %arg1[%c0_1, %c0_2] : memref<1x768xf32, #tpu.memory_space<vmem>>, vector<1x768xf32>
    %c0_3 = arith.constant 0 : index
    %c0_4 = arith.constant 0 : index
    %2 = vector.load %arg2[%c0_3, %c0_4] : memref<1x768xf32, #tpu.memory_space<vmem>>, vector<1x768xf32>
    %cst = arith.constant dense<0.000000e+00> : vector<40xf32>
    %3 = vector.multi_reduction <add>, %0, %cst [1] : vector<40x768xf32> to vector<40xf32>
    %4 = vector.shape_cast %3 : vector<40xf32> to vector<40x1xf32>
    %cst_5 = arith.constant 7.680000e+02 : f32
    %5 = vector.broadcast %cst_5 : f32 to vector<40x1xf32>
    %6 = arith.divf %4, %5 : vector<40x1xf32>
    %7 = vector.broadcast %6 : vector<40x1xf32> to vector<40x768xf32>
    %8 = arith.subf %0, %7 : vector<40x768xf32>
    %9 = arith.mulf %8, %8 : vector<40x768xf32>
    %cst_6 = arith.constant dense<0.000000e+00> : vector<40xf32>
    %10 = vector.multi_reduction <add>, %9, %cst_6 [1] : vector<40x768xf32> to vector<40xf32>
    %11 = vector.shape_cast %10 : vector<40xf32> to vector<40x1xf32>
    %cst_7 = arith.constant 7.680000e+02 : f32
    %12 = vector.broadcast %cst_7 : f32 to vector<40x1xf32>
    %13 = arith.divf %11, %12 : vector<40x1xf32>
    %14 = vector.broadcast %6 : vector<40x1xf32> to vector<40x768xf32>
    %15 = arith.subf %0, %14 : vector<40x768xf32>
    %cst_8 = arith.constant 9.99999974E-6 : f32
    %16 = vector.broadcast %cst_8 : f32 to vector<40x1xf32>
    %17 = arith.addf %13, %16 : vector<40x1xf32>
    %18 = math.rsqrt %17 : vector<40x1xf32>
    %19 = vector.broadcast %18 : vector<40x1xf32> to vector<40x768xf32>
    %20 = arith.mulf %15, %19 : vector<40x768xf32>
    %21 = vector.broadcast %1 : vector<1x768xf32> to vector<40x768xf32>
    %22 = arith.mulf %20, %21 : vector<40x768xf32>
    %23 = vector.broadcast %2 : vector<1x768xf32> to vector<40x768xf32>
    %24 = arith.addf %22, %23 : vector<40x768xf32>
    %c0_9 = arith.constant 0 : index
    %c0_10 = arith.constant 0 : index
    %25 = vector.load %arg3[%c0_9, %c0_10] : memref<40x768xf32, #tpu.memory_space<vmem>>, vector<40x768xf32>
    tpu.vector_store %arg3[%c0_9, %c0_10], %24 {strides = array<i32>} : memref<40x768xf32, #tpu.memory_space<vmem>>, vector<40x768xf32>,
    return
  }
}

</mosaic_0001>

<bundles_post_ra>
// kernel: tpu_custom_call.1
= control target key start
LH: loop header
LB: loop body
LE: loop exit
PB: predicated region body
PF: predicated region fallthrough
CT: control target
= control target key end

     0   :  { %8 = vsyncpa [#allocation3], 0  ;;  %s911_s0 = inlined_call_operand.hbm [shape: f32[40,768], index: 0, kind: input, shape index: {}]   ;;  %s912_s1 = inlined_call_operand.hbm [shape: f32[1,768], index: 1, kind: input, shape index: {}]   ;;  %s913_s2 = inlined_call_operand.vmem [shape: f32[1,768], index: 2, kind: input, shape index: {}]   ;;  %s914_s3 = inlined_call_operand.hbm [shape: f32[40,768], index: 3, kind: output, shape index: {}]  }
   0x1   :  { %9 = vsyncpa [#allocation6], 0 }
   0x2   :  { %10 = vsyncpa [#allocation4], 0  ;;  %s511_s12 = smov [#allocation2]   ;;  %s439_s16 = scalar_lea.hbm %s911_s0, 3840 }
   0x3   :  { %s16_s13 = sshll.u32 %s511_s12, 4  ;;  %p440_p0 = scmp.ne.s32.totalorder %s911_s0, %s439_s16  ;;  %s17_s13 = int_to_ptr.vmem [resolvable:$true] %s16_s13 }
   0x4   :  { %p443_p1 = scmp.lt.u32.totalorder %s439_s16, %s911_s0 }
   0x6   :  { %p445_p2 = pnand %p443_p1, %p440_p0 }
   0x8   :  { %448 = shalt.err (!%p445_p2)
}
   0x9   :  { %s449_s21 = scalar_lea.vmem %s17_s13, 3840  ;;  %p454_p4 = scmp.lt.s32.totalorder %s17_s13, %s17_s13 }
   0xa   :  { %p450_p3 = scmp.ne.s32.totalorder %s17_s13, %s449_s21  ;;  %p455_p5 = scmp.lt.s32.totalorder %s449_s21, %s449_s21 }
   0xc   :  { %p456_p6 = por %p455_p5, %p454_p4 }
   0xe   :  { %p457_p7 = pnand %p456_p6, %p450_p3 }
  0x10   :  { %460 = shalt.err (!%p457_p7)
}
  0x11   :  { %s512_s22 = smov 768   ;;  %s513_s23 = smov 48  }
  0x12   :  { %22 = dma.hbm_to_vmem [thread:$0]  %s911_s0, 3840, %s17_s13, [#allocation3], %s512_s22, %s512_s22, %s513_s23  }
  0x13   :  { %s514_s26 = smov [#allocation5]   ;;  %s461_s30 = scalar_lea.hbm %s912_s1, 96 }
  0x14   :  { %s29_s27 = sshll.u32 %s514_s26, 4  ;;  %p462_p8 = scmp.ne.s32.totalorder %s912_s1, %s461_s30  ;;  %s30_s27 = int_to_ptr.vmem [resolvable:$true] %s29_s27 }
  0x15   :  { %p465_p9 = scmp.lt.u32.totalorder %s461_s30, %s912_s1 }
  0x17   :  { %p467_p10 = pnand %p465_p9, %p462_p8 }
  0x19   :  { %470 = shalt.err (!%p467_p10)
}
  0x1a   :  { %s471_s8 = scalar_lea.vmem %s30_s27, 96  ;;  %p476_p12 = scmp.lt.s32.totalorder %s30_s27, %s30_s27 }
  0x1b   :  { %p472_p11 = scmp.ne.s32.totalorder %s30_s27, %s471_s8  ;;  %p477_p13 = scmp.lt.s32.totalorder %s471_s8, %s471_s8 }
  0x1d   :  { %p478_p0 = por %p477_p13, %p476_p12 }
  0x1f   :  { %p479_p1 = pnand %p478_p0, %p472_p11 }
  0x21   :  { %482 = shalt.err (!%p479_p1)
}
  0x22   :  { %32 = dma.hbm_to_vmem [thread:$0]  %s912_s1, 96, %s30_s27, [#allocation6]  }
  0x23   :  { %505 = dma.done.wait [#allocation3], 3840  }
  0x24   :  { %506 = vsyncadd [#allocation3], 4294963456 }
  0x25   :  { %507 = dma.done.wait [#allocation6], 96  }
  0x26   :  { %508 = vsyncadd [#allocation6], 4294967200  ;;  %v563_v0 = vld [vmem:[#allocation2 + $0x60] sm:$0xff]  ;;  %v565_v1 = vld [vmem:[#allocation2 + $0x68] sm:$0xff] }
  0x27   :  { %v567_v2 = vld [vmem:[#allocation2 + $0x70] sm:$0xff]  ;;  %v569_v3 = vld [vmem:[#allocation2 + $0x78] sm:$0xff]  ;;  %v87_v4 = vadd.f32 %v565_v1, %v563_v0  ;;  %v41_v5 = vld [vmem:[#allocation2] sm:$0xff] }
  0x28   :  { %v42_v6 = vld [vmem:[#allocation2 + $0x8] sm:$0xff]  ;;  %v43_v7 = vld [vmem:[#allocation2 + $0x10] sm:$0xff]  ;;  %v573_v8 = vld [vmem:[#allocation2 + $0x80] sm:$0xff] }
  0x29   :  { %v88_v9 = vadd.f32 %v87_v4, %v567_v2  ;;  %v44_v10 = vld [vmem:[#allocation2 + $0x18] sm:$0xff]  ;;  %v73_v11 = vadd.f32 %v42_v6, %v41_v5  ;;  %v576_v12 = vld [vmem:[#allocation2 + $0x90] sm:$0xff]  ;;  %v580_v14 = vld [vmem:[#allocation2 + $0xa0] sm:$0xff] }
  0x2a   :  { %v578_v13 = vld [vmem:[#allocation2 + $0x98] sm:$0xff]  ;;  %v582_v15 = vld [vmem:[#allocation2 + $0x88] sm:$0xff]  ;;  %v45_v17 = vld [vmem:[#allocation2 + $0x20] sm:$0xff] }
  0x2b   :  { %v89_v16 = vadd.f32 %v88_v9, %v569_v3  ;;  %v74_v18 = vadd.f32 %v73_v11, %v43_v7  ;;  %v585_v19 = vld [vmem:[#allocation2 + $0xa8] sm:$0xff]  ;;  %v94_v20 = vadd.f32 %v578_v13, %v576_v12  ;;  %v589_v21 = vld [vmem:[#allocation2 + $0x30] sm:$0xff]  ;;  %v591_v22 = vld [vmem:[#allocation2 + $0x38] sm:$0xff] }
  0x2c   :  { %v593_v23 = vld [vmem:[#allocation2 + $0x40] sm:$0xff]  ;;  %v46_v25 = vld [vmem:[#allocation2 + $0x28] sm:$0xff]  ;;  %v596_v27 = vld [vmem:[#allocation2 + $0xb0] sm:$0xff]  ;;  %v80_v29 = vadd.f32 %v591_v22, %v589_v21 }
  0x2d   :  { %v90_v24 = vadd.f32 %v89_v16, %v573_v8  ;;  %v75_v26 = vadd.f32 %v74_v18, %v44_v10  ;;  %v95_v28 = vadd.f32 %v94_v20, %v580_v14  ;;  %v601_v30 = vld [vmem:[#allocation2 + $0x48] sm:$0xff]  ;;  %v603_v31 = vld [vmem:[#allocation2 + $0xc0] sm:$0xff]  ;;  %v610_v37 = vld [vmem:[#allocation2 + $0xd0] sm:$0xff] }
  0x2e   :  { %v605_v32 = vld [vmem:[#allocation2 + $0xc8] sm:$0xff]  ;;  %v81_v36 = vadd.f32 %v80_v29, %v593_v23  ;;  %v612_v38 = vld [vmem:[#allocation2 + $0xb8] sm:$0xff]  ;;  %v614_v39 = vld [vmem:[#allocation2 + $0x50] sm:$0xff] }
  0x2f   :  { %v91_v33 = vadd.f32 %v90_v24, %v582_v15  ;;  %v76_v34 = vadd.f32 %v75_v26, %v45_v17  ;;  %v96_v35 = vadd.f32 %v95_v28, %v585_v19  ;;  %v101_v40 = vadd.f32 %v605_v32, %v603_v31  ;;  %v620_v44 = vld [vmem:[#allocation2 + $0xd8] sm:$0xff]  ;;  %v627_v49 = vld [vmem:[#allocation2 + $0xe0] sm:$0xff]  ;;  %v631_v52 = vld [vmem:[#allocation2 + $0xe8] sm:$0xff] }
  0x30   :  { %v82_v43 = vadd.f32 %v81_v36, %v601_v30  ;;  %v622_v45 = vld [vmem:[#allocation2 + $0x58] sm:$0xff] }
  0x31   :  { %92 = vadd.xlane.f32.xlu1 %v91_v33  ;;  %v77_v41 = vadd.f32 %v76_v34, %v46_v25  ;;  %v97_v42 = vadd.f32 %v96_v35, %v596_v27  ;;  %v102_v46 = vadd.f32 %v101_v40, %v610_v37 }
  0x32   :  { %v83_v48 = vadd.f32 %v82_v43, %v614_v39 }
  0x33   :  { %78 = vadd.xlane.f32.xlu0 %v77_v41  ;;  %v98_v47 = vadd.f32 %v97_v42, %v612_v38  ;;  %v103_v50 = vadd.f32 %v102_v46, %v620_v44 }
  0x34   :  { %v84_v51 = vadd.f32 %v83_v48, %v622_v45 }
  0x35   :  { %99 = vadd.xlane.f32.xlu1 %v98_v47  ;;  %v104_v53 = vadd.f32 %v103_v50, %v627_v49 }
  0x37   :  { %85 = vadd.xlane.f32.xlu0 %v84_v51  ;;  %v105_v54 = vadd.f32 %v104_v53, %v631_v52 }
  0x3b   :  { %106 = vadd.xlane.f32.xlu0 %v105_v54 }
  0xbe   :  { %v93_v55 = vpop.xlane.xlu1 %92 }
  0xbf   :  { %v111_v56 = vmul.f32 0.0013020834, %v93_v55 }
  0xc0   :  { %v79_v57 = vpop.xlane.xlu0 %78 }
  0xc1   :  { %v109_v58 = vmul.f32 0.0013020834, %v79_v57  ;;  %v636_v59 = vsub.f32 %v563_v0, %v111_v56  ;;  %v639_v60 = vsub.f32 %v565_v1, %v111_v56  ;;  %v648_v4 = vsub.f32 %v567_v2, %v111_v56 }
  0xc2   :  { %v100_v9 = vpop.xlane.xlu1 %99  ;;  %v653_v18 = vsub.f32 %v569_v3, %v111_v56  ;;  %v669_v3 = vsub.f32 %v582_v15, %v111_v56 }
  0xc3   :  { %v641_v61 = vsub.f32 %v41_v5, %v109_v58  ;;  %v643_v62 = vsub.f32 %v42_v6, %v109_v58  ;;  %v645_v63 = vsub.f32 %v43_v7, %v109_v58  ;;  %v650_v16 = vsub.f32 %v44_v10, %v109_v58 }
  0xc4   :  { %v86_v11 = vpop.xlane.xlu0 %85  ;;  %v156_v0 = vmul.f32 %v636_v59, %v636_v59  ;;  %v657_v5 = vsub.f32 %v45_v17, %v109_v58  ;;  %v663_v7 = vsub.f32 %v46_v25, %v109_v58  ;;  %v666_v10 = vsub.f32 %v573_v8, %v111_v56 }
  0xc5   :  { %v110_v1 = vmul.f32 0.0013020834, %v86_v11  ;;  %v144_v6 = vmul.f32 %v641_v61, %v641_v61  ;;  %v145_v2 = vmul.f32 %v643_v62, %v643_v62  ;;  %v157_v20 = vmul.f32 %v639_v60, %v639_v60 }
  0xc6   :  { %v112_v24 = vmul.f32 0.0013020834, %v100_v9  ;;  %v146_v17 = vmul.f32 %v645_v63, %v645_v63  ;;  %v158_v28 = vmul.f32 %v648_v4, %v648_v4  ;;  %v159_v25 = vmul.f32 %v653_v18, %v653_v18 }
  0xc7   :  { %v174_v26 = vadd.f32 %v145_v2, %v144_v6  ;;  %v188_v8 = vadd.f32 %v157_v20, %v156_v0  ;;  %v680_v33 = vsub.f32 %v589_v21, %v110_v1  ;;  %v683_v15 = vsub.f32 %v591_v22, %v110_v1 }
  0xc8   :  { %v107_v29 = vpop.xlane.xlu0 %106  ;;  %v147_v34 = vmul.f32 %v650_v16, %v650_v16  ;;  %v148_v35 = vmul.f32 %v657_v5, %v657_v5  ;;  %v690_v40 = vsub.f32 %v593_v23, %v110_v1  ;;  %v149_v41 = vmul.f32 %v663_v7, %v663_v7 }
  0xc9   :  { %v175_v36 = vadd.f32 %v174_v26, %v146_v17  ;;  %v189_v42 = vadd.f32 %v188_v8, %v158_v28  ;;  %v695_v21 = vsub.f32 %v601_v30, %v110_v1  ;;  %v150_v22 = vmul.f32 %v680_v33, %v680_v33 }
  0xca   :  { %v113_v43 = vmul.f32 0.0013020834, %v107_v29  ;;  %v160_v47 = vmul.f32 %v666_v10, %v666_v10  ;;  %v151_v48 = vmul.f32 %v683_v15, %v683_v15  ;;  %v704_v50 = vsub.f32 %v614_v39, %v110_v1 }
  0xcb   :  { %v176_v46 = vadd.f32 %v175_v36, %v147_v34  ;;  %v190_v23 = vadd.f32 %v189_v42, %v159_v25  ;;  %v152_v51 = vmul.f32 %v690_v40, %v690_v40  ;;  %v709_v30 = vsub.f32 %v576_v12, %v112_v24 }
  0xcc   :  { %v181_v54 = vadd.f32 %v151_v48, %v150_v22  ;;  %v712_v55 = vsub.f32 %v578_v13, %v112_v24  ;;  %v715_v56 = vsub.f32 %v580_v14, %v112_v24  ;;  %v718_v58 = vsub.f32 %v622_v45, %v110_v1 }
  0xcd   :  { %v177_v53 = vadd.f32 %v176_v46, %v148_v35  ;;  %v191_v57 = vadd.f32 %v190_v23, %v160_v47  ;;  %v153_v39 = vmul.f32 %v695_v21, %v695_v21  ;;  %v723_v9 = vsub.f32 %v585_v19, %v112_v24 }
  0xce   :  { %v182_v11 = vadd.f32 %v181_v54, %v152_v51  ;;  %v162_v0 = vmul.f32 %v709_v30, %v709_v30  ;;  %v163_v13 = vmul.f32 %v712_v55, %v712_v55  ;;  %v161_v14 = vmul.f32 %v669_v3, %v669_v3 }
  0xcf   :  { %v178_v12 = vadd.f32 %v177_v53, %v149_v41  ;;  %v154_v45 = vmul.f32 %v704_v50, %v704_v50  ;;  %v734_v1 = vsub.f32 %v596_v27, %v112_v24  ;;  %v164_v19 = vmul.f32 %v715_v56, %v715_v56 }
  0xd0   :  { %v183_v6 = vadd.f32 %v182_v11, %v153_v39  ;;  %v165_v2 = vmul.f32 %v723_v9, %v723_v9  ;;  %v195_v20 = vadd.f32 %v163_v13, %v162_v0  ;;  %v741_v17 = vsub.f32 %v603_v31, %v113_v43 }
  0xd1   :  { %179 = vadd.xlane.f32.xlu1 %v178_v12  ;;  %v155_v26 = vmul.f32 %v718_v58, %v718_v58  ;;  %v746_v28 = vsub.f32 %v612_v38, %v112_v24  ;;  %v749_v27 = vsub.f32 %v605_v32, %v113_v43  ;;  %v752_v29 = vsub.f32 %v610_v37, %v113_v43 }
  0xd2   :  { %v192_v25 = vadd.f32 %v191_v57, %v161_v14  ;;  %v184_v8 = vadd.f32 %v183_v6, %v154_v45  ;;  %v196_v34 = vadd.f32 %v195_v20, %v164_v19  ;;  %v168_v35 = vmul.f32 %v741_v17, %v741_v17  ;;  %v71_v20 = vld [vmem:[#allocation5] sm:$0x3f] }
  0xd3   :  { %v757_v31 = vsub.f32 %v620_v44, %v113_v43  ;;  %v169_v36 = vmul.f32 %v749_v27, %v749_v27  ;;  %v166_v32 = vmul.f32 %v734_v1, %v734_v1  ;;  %v764_v37 = vsub.f32 %v627_v49, %v113_v43 }
  0xd4   :  { %v185_v38 = vadd.f32 %v184_v8, %v155_v26  ;;  %v197_v24 = vadd.f32 %v196_v34, %v165_v2  ;;  %v170_v41 = vmul.f32 %v752_v29, %v752_v29  ;;  %v167_v44 = vmul.f32 %v746_v28, %v746_v28 }
  0xd5   :  { %193 = vadd.xlane.f32.xlu1 %v192_v25  ;;  %v202_v42 = vadd.f32 %v169_v36, %v168_v35  ;;  %v771_v46 = vsub.f32 %v631_v52, %v113_v43  ;;  %v171_v47 = vmul.f32 %v757_v31, %v757_v31  ;;  %v172_v49 = vmul.f32 %v764_v37, %v764_v37 }
  0xd6   :  { %186 = vadd.xlane.f32.xlu0 %v185_v38  ;;  %v198_v22 = vadd.f32 %v197_v24, %v166_v32  ;;  %v255_v39 = vlaneseq  ;;  %v72_v38 = vld [vmem:[%s913_s2] sm:$0x3f]  ;;  %s515_s2 = smov [#allocation7]  }
  0xd7   :  { %v203_v48 = vadd.f32 %v202_v42, %v170_v41  ;;  %v173_v53 = vmul.f32 %v771_v46, %v771_v46  ;;  %s411_s11 = sshll.u32 %s515_s2, 4  ;;  %s412_s11 = int_to_ptr.vmem [resolvable:$true] %s411_s11 }
  0xd8   :  { %v199_v23 = vadd.f32 %v198_v22, %v167_v44  ;;  %v256_v11 = vshrl.u32 %v255_v39, 7  ;;  %s483_s12 = scalar_lea.vmem %s412_s11, 3840  ;;  %p488_p3 = scmp.lt.s32.totalorder %s412_s11, %s412_s11 }
  0xd9   :  { %v204_v51 = vadd.f32 %v203_v48, %v171_v47  ;;  %p484_p2 = scmp.ne.s32.totalorder %s412_s11, %s483_s12  ;;  %p489_p4 = scmp.lt.s32.totalorder %s483_s12, %s483_s12 }
  0xda   :  { %200 = vadd.xlane.f32.xlu0 %v199_v23  ;;  %v257_v6 = vsub.s32 0, %v256_v11  ;;  %v261_v2 = vsub.s32 1, %v256_v11  ;;  %v265_v26 = vsub.s32 2, %v256_v11  ;;  %v269_v25 = vsub.s32 3, %v256_v11 }
  0xdb   :  { %v205_v54 = vadd.f32 %v204_v51, %v172_v49  ;;  %v273_v34 = vsub.s32 4, %v256_v11  ;;  %v277_v35 = vsub.s32 5, %v256_v11  ;;  %p490_p5 = por %p489_p4, %p488_p3 }
  0xdc   :  { %v782_v24 = vrot.slane %v71_v20, %v257_v6  ;;  %v784_v41 = vrot.slane %v71_v20, %v261_v2  ;;  %v786_v42 = vrot.slane %v71_v20, %v265_v26  ;;  %v788_v44 = vrot.slane %v71_v20, %v269_v25 }
  0xdd   :  { %v206_v57 = vadd.f32 %v205_v54, %v173_v53  ;;  %v790_v47 = vrot.slane %v71_v20, %v273_v34  ;;  %v792_v48 = vrot.slane %v71_v20, %v277_v35  ;;  %v794_v23 = vrot.slane %v72_v38, %v257_v6  ;;  %p491_p6 = pnand %p490_p5, %p484_p2 }
  0xde   :  { %v796_v49 = vrot.slane %v72_v38, %v261_v2  ;;  %v798_v53 = vrot.slane %v72_v38, %v265_v26  ;;  %v800_v54 = vrot.slane %v72_v38, %v269_v25 }
  0xdf   :  { %207 = vadd.xlane.f32.xlu1 %v206_v57  ;;  %v802_v57 = vrot.slane %v72_v38, %v273_v34 }
 0x15e   :  { %v180_v12 = vpop.xlane.xlu1 %179 }
 0x15f   :  { %v209_v52 = vmul.f32 0.0013020834, %v180_v12 }
 0x161   :  { %v214_v43 = vadd.f32 1e-05, %v209_v52 }
 0x162   :  { %v194_v0 = vpop.xlane.xlu1 %193 }
 0x163   :  { %429 = vrsqrt.f32 %v214_v43  ;;  %v211_v13 = vmul.f32 0.0013020834, %v194_v0  ;;  %v187_v14 = vpop.xlane.xlu0 %186  ;;  %v808_v0 = vrot.slane %v72_v38, %v277_v35 }
 0x164   :  { %v210_v19 = vmul.f32 0.0013020834, %v187_v14 }
 0x165   :  { %v216_v45 = vadd.f32 1e-05, %v211_v13 }
 0x166   :  { %v215_v8 = vadd.f32 1e-05, %v210_v19 }
 0x167   :  { %431 = vrsqrt.f32 %v216_v45  ;;  %v201_v36 = vpop.xlane.xlu0 %200 }
 0x168   :  { %433 = vrsqrt.f32 %v215_v8  ;;  %v212_v32 = vmul.f32 0.0013020834, %v201_v36 }
 0x16a   :  { %v217_v22 = vadd.f32 1e-05, %v212_v32 }
 0x16c   :  { %v208_v39 = vpop.xlane.xlu1 %207  ;;  %435 = vrsqrt.f32 %v217_v22 }
 0x16d   :  { %v430_v51 = vpop.eup %429  ;;  %v213_v45 = vmul.f32 0.0013020834, %v208_v39 }
 0x16e   :  { %v224_v12 = vmul.f32 %v430_v51, %v641_v61  ;;  %v225_v52 = vmul.f32 %v430_v51, %v643_v62  ;;  %v226_v43 = vmul.f32 %v430_v51, %v645_v63  ;;  %v227_v11 = vmul.f32 %v430_v51, %v650_v16 }
 0x16f   :  { %v228_v13 = vmul.f32 %v430_v51, %v657_v5  ;;  %v229_v14 = vmul.f32 %v430_v51, %v663_v7  ;;  %v218_v20 = vadd.f32 1e-05, %v213_v45 }
 0x170   :  { %v285_v19 = vmul.f32 %v782_v24, %v224_v12  ;;  %v286_v6 = vmul.f32 %v784_v41, %v225_v52  ;;  %v287_v2 = vmul.f32 %v786_v42, %v226_v43  ;;  %v288_v61 = vmul.f32 %v788_v44, %v227_v11 }
 0x171   :  { %v432_v62 = vpop.eup %431  ;;  %v289_v63 = vmul.f32 %v790_v47, %v228_v13  ;;  %v290_v16 = vmul.f32 %v792_v48, %v229_v14  ;;  %437 = vrsqrt.f32 %v218_v20 }
 0x172   :  { %v346_v26 = vadd.f32 %v794_v23, %v285_v19  ;;  %v347_v5 = vadd.f32 %v796_v49, %v286_v6  ;;  %v348_v7 = vadd.f32 %v798_v53, %v287_v2  ;;  %v349_v25 = vadd.f32 %v800_v54, %v288_v61  ;;  %v434_v8 = vpop.eup %433 }
 0x173   :  { %v350_v34 = vadd.f32 %v802_v57, %v289_v63  ;;  %v351_v35 = vadd.f32 %v808_v0, %v290_v16  ;;  %v236_v36 = vmul.f32 %v432_v62, %v636_v59  ;;  %v237_v38 = vmul.f32 %v432_v62, %v639_v60 }
 0x174   :  { %376 = vst [vmem:[#allocation7] sm:$0xff] %v346_v26  ;;  %377 = vst [vmem:[#allocation7 + $0x8] sm:$0xff] %v347_v5  ;;  %v238_v32 = vmul.f32 %v432_v62, %v648_v4  ;;  %v239_v22 = vmul.f32 %v432_v62, %v653_v18  ;;  %v240_v51 = vmul.f32 %v432_v62, %v666_v10 }
 0x175   :  { %378 = vst [vmem:[#allocation7 + $0x10] sm:$0xff] %v348_v7  ;;  %379 = vst [vmem:[#allocation7 + $0x18] sm:$0xff] %v349_v25  ;;  %v241_v39 = vmul.f32 %v432_v62, %v669_v3  ;;  %v297_v12 = vmul.f32 %v782_v24, %v236_v36  ;;  %v298_v59 = vmul.f32 %v784_v41, %v237_v38 }
 0x176   :  { %380 = vst [vmem:[#allocation7 + $0x20] sm:$0xff] %v350_v34  ;;  %381 = vst [vmem:[#allocation7 + $0x28] sm:$0xff] %v351_v35  ;;  %v230_v60 = vmul.f32 %v434_v8, %v680_v33  ;;  %v231_v52 = vmul.f32 %v434_v8, %v683_v15  ;;  %v299_v43 = vmul.f32 %v786_v42, %v238_v32  ;;  %v436_v11 = vpop.eup %435 }
 0x177   :  { %v300_v4 = vmul.f32 %v788_v44, %v239_v22  ;;  %v301_v18 = vmul.f32 %v790_v47, %v240_v51  ;;  %v302_v10 = vmul.f32 %v792_v48, %v241_v39  ;;  %v358_v3 = vadd.f32 %v794_v23, %v297_v12 }
 0x178   :  { %v359_v13 = vadd.f32 %v796_v49, %v298_v59  ;;  %v232_v14 = vmul.f32 %v434_v8, %v690_v40  ;;  %v233_v45 = vmul.f32 %v434_v8, %v695_v21  ;;  %v360_v33 = vadd.f32 %v798_v53, %v299_v43 }
 0x179   :  { %v361_v15 = vadd.f32 %v800_v54, %v300_v4  ;;  %v362_v19 = vadd.f32 %v802_v57, %v301_v18  ;;  %v363_v6 = vadd.f32 %v808_v0, %v302_v10  ;;  %388 = vst [vmem:[#allocation7 + $0x60] sm:$0xff] %v358_v3  ;;  %v234_v2 = vmul.f32 %v434_v8, %v704_v50 }
 0x17a   :  { %389 = vst [vmem:[#allocation7 + $0x68] sm:$0xff] %v359_v13  ;;  %v235_v61 = vmul.f32 %v434_v8, %v718_v58  ;;  %v291_v62 = vmul.f32 %v782_v24, %v230_v60  ;;  %v292_v40 = vmul.f32 %v784_v41, %v231_v52  ;;  %390 = vst [vmem:[#allocation7 + $0x70] sm:$0xff] %v360_v33 }
 0x17b   :  { %391 = vst [vmem:[#allocation7 + $0x78] sm:$0xff] %v361_v15  ;;  %392 = vst [vmem:[#allocation7 + $0x80] sm:$0xff] %v362_v19  ;;  %v293_v21 = vmul.f32 %v786_v42, %v232_v14  ;;  %v294_v63 = vmul.f32 %v788_v44, %v233_v45  ;;  %v242_v16 = vmul.f32 %v436_v11, %v709_v30  ;;  %v438_v52 = vpop.eup %437 }
 0x17c   :  { %393 = vst [vmem:[#allocation7 + $0x88] sm:$0xff] %v363_v6  ;;  %v295_v26 = vmul.f32 %v790_v47, %v234_v2  ;;  %v296_v50 = vmul.f32 %v792_v48, %v235_v61  ;;  %v352_v58 = vadd.f32 %v794_v23, %v291_v62  ;;  %v353_v5 = vadd.f32 %v796_v49, %v292_v40 }
 0x17d   :  { %v354_v7 = vadd.f32 %v798_v53, %v293_v21  ;;  %v355_v25 = vadd.f32 %v800_v54, %v294_v63  ;;  %v243_v8 = vmul.f32 %v436_v11, %v712_v55  ;;  %v244_v34 = vmul.f32 %v436_v11, %v715_v56 }
 0x17e   :  { %v356_v20 = vadd.f32 %v802_v57, %v295_v26  ;;  %v357_v30 = vadd.f32 %v808_v0, %v296_v50  ;;  %382 = vst [vmem:[#allocation7 + $0x30] sm:$0xff] %v352_v58  ;;  %383 = vst [vmem:[#allocation7 + $0x38] sm:$0xff] %v353_v5  ;;  %v245_v35 = vmul.f32 %v436_v11, %v723_v9 }
 0x17f   :  { %v246_v36 = vmul.f32 %v436_v11, %v734_v1  ;;  %384 = vst [vmem:[#allocation7 + $0x40] sm:$0xff] %v354_v7  ;;  %385 = vst [vmem:[#allocation7 + $0x48] sm:$0xff] %v355_v25  ;;  %v247_v38 = vmul.f32 %v436_v11, %v746_v28  ;;  %v303_v32 = vmul.f32 %v782_v24, %v242_v16 }
 0x180   :  { %v304_v55 = vmul.f32 %v784_v41, %v243_v8  ;;  %v305_v56 = vmul.f32 %v786_v42, %v244_v34  ;;  %386 = vst [vmem:[#allocation7 + $0x50] sm:$0xff] %v356_v20  ;;  %387 = vst [vmem:[#allocation7 + $0x58] sm:$0xff] %v357_v30  ;;  %v306_v22 = vmul.f32 %v788_v44, %v245_v35 }
 0x181   :  { %v307_v51 = vmul.f32 %v790_v47, %v246_v36  ;;  %v308_v9 = vmul.f32 %v792_v48, %v247_v38  ;;  %v364_v1 = vadd.f32 %v794_v23, %v303_v32  ;;  %v248_v43 = vmul.f32 %v438_v52, %v741_v17 }
 0x182   :  { %v365_v39 = vadd.f32 %v796_v49, %v304_v55  ;;  %v366_v28 = vadd.f32 %v798_v53, %v305_v56  ;;  %v367_v12 = vadd.f32 %v800_v54, %v306_v22  ;;  %v249_v4 = vmul.f32 %v438_v52, %v749_v27 }
 0x183   :  { %v368_v59 = vadd.f32 %v802_v57, %v307_v51  ;;  %v369_v60 = vadd.f32 %v808_v0, %v308_v9  ;;  %394 = vst [vmem:[#allocation7 + $0x90] sm:$0xff] %v364_v1  ;;  %v250_v18 = vmul.f32 %v438_v52, %v752_v29  ;;  %v251_v10 = vmul.f32 %v438_v52, %v757_v31 }
 0x184   :  { %395 = vst [vmem:[#allocation7 + $0x98] sm:$0xff] %v365_v39  ;;  %396 = vst [vmem:[#allocation7 + $0xa0] sm:$0xff] %v366_v28  ;;  %v252_v11 = vmul.f32 %v438_v52, %v764_v37  ;;  %v253_v3 = vmul.f32 %v438_v52, %v771_v46  ;;  %v309_v13 = vmul.f32 %v782_v24, %v248_v43 }
 0x185   :  { %397 = vst [vmem:[#allocation7 + $0xa8] sm:$0xff] %v367_v12  ;;  %398 = vst [vmem:[#allocation7 + $0xb0] sm:$0xff] %v368_v59  ;;  %v310_v14 = vmul.f32 %v784_v41, %v249_v4  ;;  %v311_v45 = vmul.f32 %v786_v42, %v250_v18  ;;  %v312_v33 = vmul.f32 %v788_v44, %v251_v10 }
 0x186   :  { %399 = vst [vmem:[#allocation7 + $0xb8] sm:$0xff] %v369_v60  ;;  %v313_v17 = vmul.f32 %v790_v47, %v252_v11  ;;  %v314_v27 = vmul.f32 %v792_v48, %v253_v3  ;;  %v370_v29 = vadd.f32 %v794_v23, %v309_v13 }
 0x187   :  { %v371_v31 = vadd.f32 %v796_v49, %v310_v14  ;;  %v372_v37 = vadd.f32 %v798_v53, %v311_v45  ;;  %v373_v46 = vadd.f32 %v800_v54, %v312_v33 }
 0x188   :  { %v374_v24 = vadd.f32 %v802_v57, %v313_v17  ;;  %v375_v41 = vadd.f32 %v808_v0, %v314_v27  ;;  %400 = vst [vmem:[#allocation7 + $0xc0] sm:$0xff] %v370_v29 }
 0x189   :  { %401 = vst [vmem:[#allocation7 + $0xc8] sm:$0xff] %v371_v31  ;;  %402 = vst [vmem:[#allocation7 + $0xd0] sm:$0xff] %v372_v37 }
 0x18a   :  { %403 = vst [vmem:[#allocation7 + $0xd8] sm:$0xff] %v373_v46  ;;  %404 = vst [vmem:[#allocation7 + $0xe0] sm:$0xff] %v374_v24 }
 0x18b   :  { %405 = vst [vmem:[#allocation7 + $0xe8] sm:$0xff] %v375_v41 }
 0x18c   :  { %494 = shalt.err (!%p491_p6)
}
 0x18d   :  { %s495_s15 = scalar_lea.hbm %s914_s3, 3840 }
 0x18e   :  { %p496_p7 = scmp.ne.s32.totalorder %s914_s3, %s495_s15  ;;  %p499_p8 = scmp.lt.u32.totalorder %s495_s15, %s914_s3 }
 0x190   :  { %p501_p9 = pnand %p499_p8, %p496_p7 }
 0x192   :  { %504 = shalt.err (!%p501_p9)
}
 0x193   :  { %417 = dma.vmem_to_hbm [thread:$0]  %s412_s11, 3840, %s914_s3, [#allocation4], %s512_s22, %s512_s22, %s513_s23  }
 0x194   :  { %509 = dma.done.wait [#allocation4], 3840  }
 0x195   :  { %510 = vsyncadd [#allocation4], 4294963456 }
 0x196   :  { %421 = vsyncpa [#allocation3], 1 }
 0x197   :  { %422 = vsyncpa [#allocation6], 1 }
 0x198   :  { %423 = vsyncpa [#allocation4], 1 }

</bundles_post_ra>
